<compile_context>
chip_gen: v7x
topology: tpu7x:2x2x1
jax: 0.10.0
libtpu: 0.0.40
codegen_flags: <defaults>
</compile_context>

<pallas_src>
import functools

import jax
import jax.numpy as jnp
from jax.experimental import pallas as pl
from jax.experimental.pallas import tpu as pltpu


# ---------------------------------------------------------------------------
# Row-tiled MLP head.  Transposed compute layout (rows on the lane axis):
#   cfg_ref  : (tile_r, cfg_d)   config features, native dtype (row-major HBM)
#   w1bT_ref : (hidden, cfg_d)   config-half of W1, transposed, compute dtype
#   bias_ref : (hidden, 1)       fused op-embedding bias (f32), loop-invariant
#   w2_ref   : (hidden, 1)       Linear(hidden -> 1) weight column (f32)
#   b2_ref   : (1, 1)
#   out_ref  : (1, tile_r)       lane-dense output row (f32)
# ---------------------------------------------------------------------------
def _row_mlp_kernel(cfg_ref, w1bT_ref, bias_ref, w2_ref, b2_ref, out_ref,
                    *, compute_dtype):
    cfg = cfg_ref[...].astype(compute_dtype)                      # (tile_r, cfg_d)
    # Contract cfg_d of both operands -> (hidden, tile_r): rows land on the
    # lane axis without any wrapper-side HBM transpose pass.
    h = jax.lax.dot_general(
        w1bT_ref[...], cfg,
        dimension_numbers=(((1,), (1,)), ((), ())),
        preferred_element_type=jnp.float32)                       # (hidden, tile_r)
    h = h + bias_ref[...]                                         # lane broadcast
    h = jnp.where(h > 0, h, 0.01 * h)                             # LeakyReLU(0.01)
    # Linear(hidden -> 1): VPU multiply + sublane (XLU) reduce -> (1, tile_r)
    out_ref[...] = jnp.sum(h * w2_ref[...], axis=0, keepdims=True) + b2_ref[...]


def mlp_forward(op_indices, emb_table, config_feats, w1, b1, w2, b2,
                *, num_configs, tile_r=2048, compute_dtype=jnp.bfloat16):
    """Forward of the MLP module.

    op_indices   : (num_nodes,) int
    emb_table    : (num_ops, embed_d)
    config_feats : (batch, num_configs, cfg_d)
    w1           : (embed_d + cfg_d, hidden)  (transposed vs torch Linear.weight)
    b1           : (hidden,)
    w2           : (hidden, 1)
    b2           : (1,)
    returns      : (batch, num_configs) float32
    """
    batch = config_feats.shape[0]
    cfg_d = config_feats.shape[-1]
    rows = batch * num_configs
    embed_d = emb_table.shape[1]
    hidden = w1.shape[1]

    # ---- loop-invariant embedding path, plain JAX (tiny, off the hot path) --
    # combined @ W1 == op_feats @ W1[:E] + cfg @ W1[E:], and op_feats is the
    # same for every row, so fold the op half + b1 into one (hidden,) bias.
    op_sum = jnp.sum(emb_table[op_indices.astype(jnp.int32)], axis=0)  # (embed_d,)
    fused_bias = op_sum @ w1[:embed_d].astype(jnp.float32) + b1        # (hidden,)
    bias_col = fused_bias.reshape(hidden, 1).astype(jnp.float32)

    # ---- tile-size selection -------------------------------------------------
    # Honor the requested tile (multiple of 128); only shrink it to guarantee
    # at least 2 grid steps when the row count allows, so the single
    # "parallel" grid axis can split across v7x's two TensorCores.
    tile_r = max(128, (tile_r // 128) * 128)
    rows_up = pl.cdiv(rows, 128) * 128
    if rows_up >= 2 * 128:
        tile_r = min(tile_r, max(128, (rows_up // 2 // 128) * 128))
    else:
        tile_r = 128
    num_tiles = pl.cdiv(rows, tile_r)
    rows_padded = num_tiles * tile_r

    # Row-major config matrix in its *native* dtype: no transpose, no cast
    # (the kernel casts in VMEM).  Padding only happens when rows is not a
    # multiple of the tile.
    cfg2d = config_feats.reshape(rows, cfg_d)
    if rows_padded != rows:
        cfg2d = jnp.pad(cfg2d, ((0, rows_padded - rows), (0, 0)))

    w1bT = w1[embed_d:].T.astype(compute_dtype)                   # (hidden, cfg_d)
    w2_col = w2.reshape(hidden, 1).astype(jnp.float32)
    b2_2d = b2.reshape(1, 1).astype(jnp.float32)

    kernel = functools.partial(_row_mlp_kernel, compute_dtype=compute_dtype)

    out = pl.pallas_call(
        kernel,
        out_shape=jax.ShapeDtypeStruct((1, rows_padded), jnp.float32),
        grid_spec=pltpu.PrefetchScalarGridSpec(
            num_scalar_prefetch=0,
            grid=(num_tiles,),
            in_specs=[
                pl.BlockSpec((tile_r, cfg_d), lambda r: (r, 0)),
                pl.BlockSpec(w1bT.shape, lambda r: (0, 0)),    # loop-invariant
                pl.BlockSpec((hidden, 1), lambda r: (0, 0)),   # loop-invariant
                pl.BlockSpec((hidden, 1), lambda r: (0, 0)),   # loop-invariant
                pl.BlockSpec((1, 1), lambda r: (0, 0)),        # loop-invariant
            ],
            out_specs=pl.BlockSpec((1, tile_r), lambda r: (0, r)),
        ),
        compiler_params=pltpu.CompilerParams(
            dimension_semantics=("parallel",)),
    )(cfg2d, w1bT, bias_col, w2_col, b2_2d)

    return out[0, :rows].reshape(batch, num_configs)


def _reference(op_indices, emb_table, config_feats, w1, b1, w2, b2, num_configs):
    """Plain-JAX mirror of the torch forward, for verification."""
    op_sum = jnp.sum(emb_table[op_indices], axis=0)                   # (embed_d,)
    batch = config_feats.shape[0]
    cfg = config_feats.reshape(batch, num_configs, config_feats.shape[-1])
    op_feats = jnp.broadcast_to(op_sum[None, None, :],
                                (batch, num_configs, op_sum.shape[0]))
    combined = jnp.concatenate([op_feats, cfg], axis=-1)
    h = combined @ w1 + b1
    h = jnp.where(h > 0, h, 0.01 * h)
    return (h @ w2 + b2).squeeze(-1)


if __name__ == "__main__":
    # Module hyperparams (MLP defaults: op_embed_dim=32, mlp_layers=2,
    # hidden_dim=64 => MLP input dim 64 => config_dim = 32).
    num_ops = 10
    op_embed_dim = 32
    config_dim = 32
    hidden_dim = 64
    num_configs = 256          # -> rows = 512 -> 2 lane-dense grid steps
    batch = 2
    num_nodes = 16

    key = jax.random.PRNGKey(0)
    k_idx, k_emb, k_cfg, k_w1, k_b1, k_w2, k_b2 = jax.random.split(key, 7)

    op_indices = jax.random.randint(k_idx, (num_nodes,), 0, num_ops, dtype=jnp.int32)
    emb_table = jax.random.normal(k_emb, (num_ops, op_embed_dim), jnp.float32) * 0.1
    config_feats = jax.random.normal(
        k_cfg, (batch, num_configs, config_dim), jnp.float32)

    # Synthetic params (shapes of nn.Linear(64, 64), nn.Linear(64, 1)).
    w1 = jax.random.normal(k_w1, (hidden_dim, hidden_dim), jnp.float32) * 0.1
    b1 = jax.random.normal(k_b1, (hidden_dim,), jnp.float32) * 0.1
    w2 = jax.random.normal(k_w2, (hidden_dim, 1), jnp.float32) * 0.1
    b2 = jax.random.normal(k_b2, (1,), jnp.float32) * 0.1

    ref = _reference(op_indices, emb_table, config_feats, w1, b1, w2, b2,
                     num_configs)

    # Exact (f32) path — tight tolerance.
    out_f32 = mlp_forward(op_indices, emb_table, config_feats, w1, b1, w2, b2,
                          num_configs=num_configs, compute_dtype=jnp.float32)
    out_f32 = jax.block_until_ready(out_f32)
    assert out_f32.shape == (batch, num_configs), out_f32.shape
    assert jnp.allclose(out_f32, ref, atol=1e-4, rtol=1e-4), (
        float(jnp.max(jnp.abs(out_f32 - ref))))

    # Fast (bf16 MXU inputs cast in VMEM, f32 accumulation) — loose tolerance.
    out_bf16 = mlp_forward(op_indices, emb_table, config_feats, w1, b1, w2, b2,
                           num_configs=num_configs, compute_dtype=jnp.bfloat16)
    out_bf16 = jax.block_until_ready(out_bf16)
    assert out_bf16.shape == (batch, num_configs), out_bf16.shape
    assert jnp.allclose(out_bf16, ref, atol=5e-2, rtol=2e-2), (
        float(jnp.max(jnp.abs(out_bf16 - ref))))

    print("KERNEL_OK")
</pallas_src>

<mosaic_0001>
module attributes {stable_mosaic.version = 11 : i64} {
  func.func @_row_mlp_kernel(%arg0: i32, %arg1: memref<256x32xf32, #tpu.memory_space<vmem>>, %arg2: memref<64x32xf32, #tpu.memory_space<vmem>>, %arg3: memref<64x1xf32, #tpu.memory_space<vmem>>, %arg4: memref<64x1xf32, #tpu.memory_space<vmem>>, %arg5: memref<1x1xf32, #tpu.memory_space<vmem>>, %arg6: memref<1x256xf32, #tpu.memory_space<vmem>>) attributes {dimension_semantics = [#tpu.dimension_semantics<parallel>], iteration_bounds = array<i64: 2>, scalar_prefetch = 0 : i64, scratch_operands = 0 : i64, tpu.core_type = #tpu.core_type<tc>, window_params = [{transform_indices = @transform_0, window_bounds = array<i64: 256, 32>}, {pipeline_mode = #tpu.pipeline_mode<synchronous>, transform_indices = @transform_1, window_bounds = array<i64: 64, 32>}, {pipeline_mode = #tpu.pipeline_mode<synchronous>, transform_indices = @transform_2, window_bounds = array<i64: 64, 1>}, {pipeline_mode = #tpu.pipeline_mode<synchronous>, transform_indices = @transform_3, window_bounds = array<i64: 64, 1>}, {pipeline_mode = #tpu.pipeline_mode<synchronous>, transform_indices = @transform_4, window_bounds = array<i64: 1, 1>}, {transform_indices = @transform_5, window_bounds = array<i64: 1, 256>}]} {
    %c0 = arith.constant 0 : index
    %c0_0 = arith.constant 0 : index
    %0 = vector.load %arg1[%c0, %c0_0] : memref<256x32xf32, #tpu.memory_space<vmem>>, vector<256x32xf32>
    %c0_1 = arith.constant 0 : index
    %c0_2 = arith.constant 0 : index
    %1 = vector.load %arg2[%c0_1, %c0_2] : memref<64x32xf32, #tpu.memory_space<vmem>>, vector<64x32xf32>
    %cst = arith.constant dense<0.000000e+00> : vector<64x256xf32>
    %2 = tpu.matmul %1, %0, %cst {dimension_numbers = #tpu.dot_dimension_numbers<[1], [1], [0], [0], [0, 0, 1, 0], [], []>} : vector<64x32xf32>, vector<256x32xf32>, vector<64x256xf32> -> vector<64x256xf32>
    %c0_3 = arith.constant 0 : index
    %c0_4 = arith.constant 0 : index
    %3 = vector.load %arg3[%c0_3, %c0_4] : memref<64x1xf32, #tpu.memory_space<vmem>>, vector<64x1xf32>
    %4 = vector.broadcast %3 : vector<64x1xf32> to vector<64x256xf32>
    %5 = arith.addf %2, %4 : vector<64x256xf32>
    %cst_5 = arith.constant 0.000000e+00 : f32
    %6 = vector.broadcast %cst_5 : f32 to vector<64x256xf32>
    %7 = arith.cmpf ogt, %5, %6 : vector<64x256xf32>
    %cst_6 = arith.constant 0.00999999977 : f32
    %8 = vector.broadcast %cst_6 : f32 to vector<64x256xf32>
    %9 = arith.mulf %8, %5 : vector<64x256xf32>
    %10 = arith.select %7, %5, %9 : vector<64x256xi1>, vector<64x256xf32>
    %c0_7 = arith.constant 0 : index
    %c0_8 = arith.constant 0 : index
    %11 = vector.load %arg4[%c0_7, %c0_8] : memref<64x1xf32, #tpu.memory_space<vmem>>, vector<64x1xf32>
    %12 = vector.broadcast %11 : vector<64x1xf32> to vector<64x256xf32>
    %13 = arith.mulf %10, %12 : vector<64x256xf32>
    %cst_9 = arith.constant dense<0.000000e+00> : vector<256xf32>
    %14 = vector.multi_reduction <add>, %13, %cst_9 [0] : vector<64x256xf32> to vector<256xf32>
    %15 = vector.shape_cast %14 : vector<256xf32> to vector<1x256xf32>
    %c0_10 = arith.constant 0 : index
    %c0_11 = arith.constant 0 : index
    %16 = vector.load %arg5[%c0_10, %c0_11] : memref<1x1xf32, #tpu.memory_space<vmem>>, vector<1x1xf32>
    %17 = vector.broadcast %16 : vector<1x1xf32> to vector<1x256xf32>
    %18 = arith.addf %15, %17 : vector<1x256xf32>
    %c0_12 = arith.constant 0 : index
    %c0_13 = arith.constant 0 : index
    %19 = vector.load %arg6[%c0_12, %c0_13] : memref<1x256xf32, #tpu.memory_space<vmem>>, vector<1x256xf32>
    tpu.vector_store %arg6[%c0_12, %c0_13], %18 {strides = array<i32>} : memref<1x256xf32, #tpu.memory_space<vmem>>, vector<1x256xf32>,
    return
  }
  func.func @transform_0(%arg0: i32) -> (i32, i32) {
    %c0_i32 = arith.constant 0 : i32
    %c0_i32_0 = arith.constant 0 : i32
    return %arg0, %c0_i32 : i32, i32
  }
  func.func @transform_1(%arg0: i32) -> (i32, i32) {
    %c0_i32 = arith.constant 0 : i32
    %c0_i32_0 = arith.constant 0 : i32
    %c0_i32_1 = arith.constant 0 : i32
    return %c0_i32, %c0_i32_0 : i32, i32
  }
  func.func @transform_2(%arg0: i32) -> (i32, i32) {
    %c0_i32 = arith.constant 0 : i32
    %c0_i32_0 = arith.constant 0 : i32
    %c0_i32_1 = arith.constant 0 : i32
    return %c0_i32, %c0_i32_0 : i32, i32
  }
  func.func @transform_3(%arg0: i32) -> (i32, i32) {
    %c0_i32 = arith.constant 0 : i32
    %c0_i32_0 = arith.constant 0 : i32
    %c0_i32_1 = arith.constant 0 : i32
    return %c0_i32, %c0_i32_0 : i32, i32
  }
  func.func @transform_4(%arg0: i32) -> (i32, i32) {
    %c0_i32 = arith.constant 0 : i32
    %c0_i32_0 = arith.constant 0 : i32
    %c0_i32_1 = arith.constant 0 : i32
    return %c0_i32, %c0_i32_0 : i32, i32
  }
  func.func @transform_5(%arg0: i32) -> (i32, i32) {
    %c0_i32 = arith.constant 0 : i32
    %c0_i32_0 = arith.constant 0 : i32
    return %c0_i32, %arg0 : i32, i32
  }
}

</mosaic_0001>

<bundles_post_ra>
// kernel: tpu_custom_call.1
= control target key start
LH: loop header
LB: loop body
LE: loop exit
PB: predicated region body
PF: predicated region fallthrough
CT: control target
= control target key end

     0   :  { %s1426_s0 = inlined_call_operand.vmem [shape: f32[512,32], index: 0, kind: input, shape index: {}]   ;;  %s1427_s1 = inlined_call_operand.vmem [shape: f32[64,32], index: 1, kind: input, shape index: {}]   ;;  %s1428_s2 = inlined_call_operand.vmem [shape: f32[64,1], index: 2, kind: input, shape index: {}]   ;;  %s1429_s3 = inlined_call_operand.vmem [shape: f32[64,1], index: 3, kind: input, shape index: {}]   ;;  %s1430_s4 = inlined_call_operand.<no memory space> [shape: f32[1,1], index: 4, kind: input, shape index: {}]   ;;  %s1431_s5 = inlined_call_operand.hbm [shape: f32[1,512], index: 5, kind: output, shape index: {}]  }
   0x1   :  { %v10_v0 = vstv %s1430_s4 }
   0x2   :  { %11 = vst [vmem:[#allocation2] sm:$0x1] %v10_v0 }
   0x3   :  { %12 = vsyncpa [#allocation4], 0 }
   0x4   :  { %14 = vsyncpa [#allocation4 + $0x1], 0  ;;  %s1105_s20 = smov 0   ;;  %s1107_s21 = smov 0  }
   0x5   :  { %s1109_s22 = smov 0   ;;  %s1111_s23 = smov 0  }
   0x6 LB: > { %s796_s4 = sadd.s32 4294967295, %s1067_s23   ;;  %s797_s24 = sadd.s32 4294967294, %s1067_s23   ;;  %s1067_s23 = sphi %s1111_s23, %s1439_s23   ;;  %s1063_s22 = sphi %s1109_s22, %s1438_s22   ;;  %s1059_s21 = sphi %s1107_s21, %s1437_s21   ;;  %s1055_s20 = sphi %s1105_s20, %s1436_s20  }
   0x7   : > { %s1128_s25 = sadd.s32 1, %s1067_s23   ;;  %s137_s26 = sadd.s32 1, %s1063_s22 }
   0x8   : > { %s134_s27 = ssub.s32 %s1067_s23, %s1128_s25  ;;  %p147_p0 = scmp.ne.s32.totalorder %s1063_s22, %s1059_s21 }
   0x9   : > { %p135_p1 = scmp.eq.s32.totalorder %s134_s27, 0  ;;  %p148_p2 = scmp.eq.s32.totalorder %s796_s4, 1 }
   0xa   : > { %p153_p3 = scmp.ne.s32.totalorder %s1059_s21, %s1055_s20  ;;  %p154_p4 = scmp.eq.s32.totalorder %s797_s24, 1 }
   0xb   : > { %s1138_s28 = scalar_select %p135_p1, %s1063_s22, %s137_s26  }
   0xc   : > { %p1140_p5 = por %p148_p2, %p147_p0  ;;  %p1144_p6 = por %p154_p4, %p153_p3 }
   0xd   : > { %p800_p7 = scmp.ge.s32.totalorder %s1067_s23, 1  ;;  %p193_p8 = scmp.lt.s32.totalorder %s1067_s23, 3 }
   0xf   : > { %p194_p9 = pnand %p800_p7, %p193_p8 }
  0x10   : > { %s1150_s6 = sshll.u32 (!%p194_p9), %s796_s4, 5  ;;  %vm316_vm0 = vcmask (!%p194_p9), 261120   ;;  %v1155_v1 = vld [vmem:[%s1427_s1] sm:$0xff] (!%p194_p9)  ;;  %v1069_v3 = vmov (!%p194_p9), 0   ;;  %v270_v5 = vld [vmem:[%s1428_s2 + $0x10] sm:$0xff] (!%p194_p9)  ;;  %v269_v6 = vld [vmem:[%s1428_s2 + $0x8] sm:$0xff] (!%p194_p9) }
  0x11   : > { %197 = sbr.rel (%p194_p9) target bundleno = 372 (0x174), region = 40  ;;  %v1160_v2 = vld [vmem:[%s1427_s1 + $0x20] sm:$0xff] (!%p194_p9)  ;;  %p222_p10 = scmp.lt.s32.totalorder (!%p194_p9), %s1150_s6, 63  ;;  %882 = vmatprep.mubr.msk.f32.mxu0 (!%p194_p9), %vm316_vm0, %v1155_v1  ;;  %1003 = vset.pattern.permute.xlu0 (!%p194_p9), %v1069_v3  ;;  %v271_v7 = vld [vmem:[%s1428_s2 + $0x18] sm:$0xff] (!%p194_p9)  ;;  %vm1187_vm1 = vmpackc.low (!%p194_p9), %vm316_vm0, %vm316_vm0 }
  0x12   : > { %890 = vmatprep.mubr.msk.f32.mxu1 (!%p194_p9), %vm316_vm0, %v1160_v2  ;;  %1004 = vset.pattern.permute.xlu1 (!%p194_p9), %v1069_v3  ;;  %v268_v4 = vld [vmem:[%s1428_s2] sm:$0xff] (!%p194_p9)  ;;  %v599_v19 = vld [vmem:[%s1429_s3 + $0x8] sm:$0xff] (!%p194_p9)  ;;  %v600_v25 = vld [vmem:[%s1429_s3 + $0x10] sm:$0xff] (!%p194_p9)  ;;  %s218_s10 = sand.u32 (!%p194_p9), 1, %s1059_s21  }
  0x13   : > { %278 = vperm.xlu0 (!%p194_p9), %1003, %v268_v4   ;;  %288 = vperm.xlu1 (!%p194_p9), %1004, %v270_v5   ;;  %v598_v18 = vld [vmem:[%s1429_s3] sm:$0xff] (!%p194_p9)  ;;  %v273_v28 = vld [vmem:[%s1428_s2 + $0x28] sm:$0xff] (!%p194_p9)  ;;  %v601_v29 = vld [vmem:[%s1429_s3 + $0x18] sm:$0xff] (!%p194_p9)  ;;  %s724_s17 = scalar_lea.sflag (!%p194_p9), [#allocation4], %s218_s10 }
  0x14   : > { %v272_v24 = vld [vmem:[%s1428_s2 + $0x20] sm:$0xff] (!%p194_p9)  ;;  %v274_v34 = vld [vmem:[%s1428_s2 + $0x30] sm:$0xff] (!%p194_p9)  ;;  %v275_v38 = vld [vmem:[%s1428_s2 + $0x38] sm:$0xff] (!%p194_p9) }
  0x15   : > { %v602_v35 = vld [vmem:[%s1429_s3 + $0x20] sm:$0xff] (!%p194_p9)  ;;  %v603_v39 = vld [vmem:[%s1429_s3 + $0x28] sm:$0xff] (!%p194_p9)  ;;  %v604_v44 = vld [vmem:[%s1429_s3 + $0x30] sm:$0xff] (!%p194_p9) }
  0x16   : > { %v605_v45 = vld [vmem:[%s1429_s3 + $0x38] sm:$0xff] (!%p194_p9)  ;;  %v688_v48 = vld [vmem:[#allocation2] sm:$0x1] (!%p194_p9)  ;;  %v262_v8 = vld [vmem:[%s1427_s1 + $0x10] sm:$0xff] (!%p194_p9) }
  0x17   : > { %283 = vperm.xlu0 (!%p194_p9), %1003, %v269_v6   ;;  %293 = vperm.xlu1 (!%p194_p9), %1004, %v271_v7  }
  0x18   : > { %s223_s11 = scalar_select %p222_p10, %s1150_s6, 63 }
  0x1a   : > { %s803_s16 = sshll.u32 %s223_s11, 3  ;;  %s801_s11 = sshll.u32 %s218_s10, 1 }
  0x1b   : > { %s1183_s27 = scalar_lea.vmem %s1426_s0, %s803_s16  ;;  %608 = vperm.xlu0 %1003, %v598_v18   ;;  %613 = vperm.xlu1 %1004, %v599_v19   ;;  %s220_s12 = scalar_lea.vmem [#allocation3], %s801_s11 }
  0x1c   : > { %v244_v9 = vld [vmem:[%s1183_s27 + $0x80] sm:$0xff]  ;;  %v245_v10 = vld [vmem:[%s1183_s27 + $0x88] sm:$0xff]  ;;  %v246_v14 = vld [vmem:[%s1183_s27 + $0x90] sm:$0xff]  ;;  %s738_s13 = sshll.u32 %s220_s12, 4  ;;  %s1384_s16 = scalar_lea.hbm %s1431_s5, %s1150_s6  ;;  %s1386_s13 = int_to_ptr.vmem [resolvable:$true] %s738_s13 }
  0x1d   : > { %v228_v11 = vld [vmem:[%s1183_s27] sm:$0xff]  ;;  %v898_v12 = vpack.c.bf16 %v245_v10, %v244_v9  ;;  %v229_v13 = vld [vmem:[%s1183_s27 + $0x8] sm:$0xff]  ;;  %v247_v15 = vld [vmem:[%s1183_s27 + $0x98] sm:$0xff]  ;;  %s1005_s18 = scalar_lea.vmem %s1386_s13, 32 }
  0x1e   : > { %v901_v16 = vpack.c.bf16 %v229_v13, %v228_v11  ;;  %v904_v17 = vpack.c.bf16 %v247_v15, %v246_v14  ;;  %v230_v20 = vld [vmem:[%s1183_s27 + $0x10] sm:$0xff]  ;;  %v231_v21 = vld [vmem:[%s1183_s27 + $0x18] sm:$0xff]  ;;  %v248_v22 = vld [vmem:[%s1183_s27 + $0xa0] sm:$0xff]  ;;  %p1006_p11 = scmp.ne.s32.totalorder %s1386_s13, %s1005_s18 }
  0x1f   : > { %900 = vmatprep.subr.msk.bf16.mxu0 %vm1187_vm1, %v898_v12  ;;  %946 = vmatprep.subr.msk.bf16.mxu1 %vm1187_vm1, %v898_v12  ;;  %v249_v23 = vld [vmem:[%s1183_s27 + $0xa8] sm:$0xff]  ;;  %v907_v26 = vpack.c.bf16 %v231_v21, %v230_v20  ;;  %v232_v30 = vld [vmem:[%s1183_s27 + $0x20] sm:$0xff]  ;;  %v250_v32 = vld [vmem:[%s1183_s27 + $0xb0] sm:$0xff] }
  0x20   : > { %903 = vmatpush3.bf16.xpose.msk.msra.mxu0 %vm1187_vm1, %v901_v16  ;;  %954 = vmatpush3.bf16.xpose.msk.msra.mxu1 %vm1187_vm1, %v901_v16  ;;  %v910_v27 = vpack.c.bf16 %v249_v23, %v248_v22  ;;  %v233_v31 = vld [vmem:[%s1183_s27 + $0x28] sm:$0xff]  ;;  %v251_v33 = vld [vmem:[%s1183_s27 + $0xb8] sm:$0xff]  ;;  %v234_v40 = vld [vmem:[%s1183_s27 + $0x30] sm:$0xff]  ;;  %p1007_p12 = pnand %p1006_p11, %p1140_p5 }
  0x21   : > { %906 = vmatprep.subr.msk.bf16.mxu0 %vm1187_vm1, %v904_v17  ;;  %947 = vmatprep.subr.msk.bf16.mxu1 %vm1187_vm1, %v904_v17  ;;  %v913_v36 = vpack.c.bf16 %v233_v31, %v232_v30  ;;  %v916_v37 = vpack.c.bf16 %v251_v33, %v250_v32  ;;  %v235_v41 = vld [vmem:[%s1183_s27 + $0x38] sm:$0xff]  ;;  %v252_v42 = vld [vmem:[%s1183_s27 + $0xc0] sm:$0xff]  ;;  %v253_v43 = vld [vmem:[%s1183_s27 + $0xc8] sm:$0xff] }
  0x22   : > { %298 = vperm.xlu0 %1003, %v272_v24   ;;  %618 = vperm.xlu1 %1004, %v600_v25   ;;  %v919_v46 = vpack.c.bf16 %v235_v41, %v234_v40  ;;  %v922_v47 = vpack.c.bf16 %v253_v43, %v252_v42  ;;  %v236_v49 = vld [vmem:[%s1183_s27 + $0x40] sm:$0xff]  ;;  %v237_v50 = vld [vmem:[%s1183_s27 + $0x48] sm:$0xff]  ;;  %v254_v51 = vld [vmem:[%s1183_s27 + $0xd0] sm:$0xff]  ;;  %p1008_p13 = pneg %p1007_p12 }
  0x23   : > { %v255_v52 = vld [vmem:[%s1183_s27 + $0xd8] sm:$0xff]  ;;  %v925_v53 = vpack.c.bf16 %v237_v50, %v236_v49  ;;  %v238_v55 = vld [vmem:[%s1183_s27 + $0x50] sm:$0xff]  ;;  %v256_v57 = vld [vmem:[%s1183_s27 + $0xe0] sm:$0xff] }
  0x24   : > { %v928_v54 = vpack.c.bf16 %v255_v52, %v254_v51  ;;  %v239_v56 = vld [vmem:[%s1183_s27 + $0x58] sm:$0xff]  ;;  %v257_v58 = vld [vmem:[%s1183_s27 + $0xe8] sm:$0xff]  ;;  %v240_v61 = vld [vmem:[%s1183_s27 + $0x60] sm:$0xff] }
  0x25   : > { %v931_v59 = vpack.c.bf16 %v239_v56, %v238_v55  ;;  %v934_v60 = vpack.c.bf16 %v257_v58, %v256_v57  ;;  %v241_v62 = vld [vmem:[%s1183_s27 + $0x68] sm:$0xff]  ;;  %v258_v63 = vld [vmem:[%s1183_s27 + $0xf0] sm:$0xff]  ;;  %v259_v0 = vld [vmem:[%s1183_s27 + $0xf8] sm:$0xff] }
  0x26   : > { %303 = vperm.xlu0 %1003, %v273_v28   ;;  %623 = vperm.xlu1 %1004, %v601_v29   ;;  %v937_v3 = vpack.c.bf16 %v241_v62, %v240_v61  ;;  %v940_v4 = vpack.c.bf16 %v259_v0, %v258_v63  ;;  %v242_v5 = vld [vmem:[%s1183_s27 + $0x70] sm:$0xff]  ;;  %v243_v6 = vld [vmem:[%s1183_s27 + $0x78] sm:$0xff]  ;;  %v261_v9 = vld [vmem:[%s1427_s1 + $0x8] sm:$0xff]  ;;  %s1071_s27 = smov [#allocation3]  }
  0x27   : > { %v943_v7 = vpack.c.bf16 %v243_v6, %v242_v5  ;;  %v265_v10 = vld [vmem:[%s1427_s1 + $0x28] sm:$0xff]  ;;  %v266_v11 = vld [vmem:[%s1427_s1 + $0x30] sm:$0xff]  ;;  %s1009_s19 = sshll.u32 %s1071_s27, 4  ;;  %s1010_s19 = int_to_ptr.vmem [resolvable:$false] %s1009_s19 }
  0x28   : > { %909 = vmatpush3.bf16.xpose.msk.msra.mxu0 %vm1187_vm1, %v907_v26  ;;  %955 = vmatpush3.bf16.xpose.msk.msra.mxu1 %vm1187_vm1, %v907_v26  ;;  %s1011_s4 = scalar_lea.vmem %s1010_s19, 64  ;;  %p1012_p0 = scmp.lt.s32.totalorder %s1386_s13, %s1010_s19 }
  0x29   : > { %912 = vmatprep.subr.msk.bf16.mxu0 %vm1187_vm1, %v910_v27  ;;  %948 = vmatprep.subr.msk.bf16.mxu1 %vm1187_vm1, %v910_v27  ;;  %p1013_p1 = scmp.lt.s32.totalorder %s1011_s4, %s1005_s18 }
  0x2a   : > { %308 = vperm.xlu0 %1003, %v274_v34   ;;  %628 = vperm.xlu1 %1004, %v602_v35  }
  0x2b   : > { %p1014_p2 = por %p1013_p1, %p1012_p0 }
  0x2d   : > { %p1015_p3 = pnand %p1014_p2, %p1008_p13 }
  0x2e   : > { %313 = vperm.xlu0 %1003, %v275_v38   ;;  %633 = vperm.xlu1 %1004, %v603_v39  }
  0x30   : > { %915 = vmatpush3.bf16.xpose.msk.msra.mxu0 %vm1187_vm1, %v913_v36  ;;  %956 = vmatpush3.bf16.xpose.msk.msra.mxu1 %vm1187_vm1, %v913_v36 }
  0x31   : > { %918 = vmatprep.subr.msk.bf16.mxu0 %vm1187_vm1, %v916_v37  ;;  %949 = vmatprep.subr.msk.bf16.mxu1 %vm1187_vm1, %v916_v37 }
  0x32   : > { %638 = vperm.xlu0 %1003, %v604_v44   ;;  %643 = vperm.xlu1 %1004, %v605_v45  }
  0x36   : > { %691 = vperm.xlu0 %1003, %v688_v48  }
  0x38   : > { %921 = vmatpush3.bf16.xpose.msk.msra.mxu0 %vm1187_vm1, %v919_v46  ;;  %957 = vmatpush3.bf16.xpose.msk.msra.mxu1 %vm1187_vm1, %v919_v46 }
  0x39   : > { %924 = vmatprep.subr.msk.bf16.mxu0 %vm1187_vm1, %v922_v47  ;;  %950 = vmatprep.subr.msk.bf16.mxu1 %vm1187_vm1, %v922_v47 }
  0x40   : > { %927 = vmatpush3.bf16.xpose.msk.msra.mxu0 %vm1187_vm1, %v925_v53  ;;  %958 = vmatpush3.bf16.xpose.msk.msra.mxu1 %vm1187_vm1, %v925_v53 }
  0x41   : > { %930 = vmatprep.subr.msk.bf16.mxu0 %vm1187_vm1, %v928_v54  ;;  %951 = vmatprep.subr.msk.bf16.mxu1 %vm1187_vm1, %v928_v54 }
  0x48   : > { %933 = vmatpush3.bf16.xpose.msk.msra.mxu0 %vm1187_vm1, %v931_v59  ;;  %959 = vmatpush3.bf16.xpose.msk.msra.mxu1 %vm1187_vm1, %v931_v59 }
  0x49   : > { %936 = vmatprep.subr.msk.bf16.mxu0 %vm1187_vm1, %v934_v60  ;;  %952 = vmatprep.subr.msk.bf16.mxu1 %vm1187_vm1, %v934_v60 }
  0x50   : > { %939 = vmatpush3.bf16.xpose.msk.msra.mxu0 %vm1187_vm1, %v937_v3  ;;  %960 = vmatpush3.bf16.xpose.msk.msra.mxu1 %vm1187_vm1, %v937_v3 }
  0x51   : > { %942 = vmatprep.subr.msk.bf16.mxu0 %vm1187_vm1, %v940_v4  ;;  %953 = vmatprep.subr.msk.bf16.mxu1 %vm1187_vm1, %v940_v4 }
  0x58   : > { %945 = vmatpush3.bf16.xpose.msk.msra.mxu0 %vm1187_vm1, %v943_v7  ;;  %961 = vmatpush3.bf16.xpose.msk.msra.mxu1 %vm1187_vm1, %v943_v7 }
  0x5f   : > { %883 = vmatmul.mubr.msk.f32.vlgmr.msra.gmra.mrb[0].mxu0 %vm316_vm0, %v1155_v1  ;;  %891 = vmatmul.mubr.msk.f32.vlgmr.msra.gmra.mrb[0].mxu1 %vm316_vm0, %v1160_v2  ;;  %v263_v1 = vld [vmem:[%s1427_s1 + $0x18] sm:$0xff] }
  0x60   : > { %884 = vmatprep.mubr.msk.f32.mxu0 %vm316_vm0, %v261_v9  ;;  %892 = vmatprep.mubr.msk.f32.mxu1 %vm316_vm0, %v265_v10  ;;  %v267_v2 = vld [vmem:[%s1427_s1 + $0x38] sm:$0xff] }
  0x63   : > { %885 = vmatmul.mubr.msk.f32.gmra.mrb[2].mxu0 %vm316_vm0, %v261_v9  ;;  %893 = vmatmul.mubr.msk.f32.gmra.mrb[2].mxu1 %vm316_vm0, %v265_v10 }
  0x64   : > { %886 = vmatprep.mubr.msk.f32.mxu0 %vm316_vm0, %v262_v8  ;;  %894 = vmatprep.mubr.msk.f32.mxu1 %vm316_vm0, %v266_v11 }
  0x67   : > { %887 = vmatmul.mubr.msk.f32.gmra.mrb[4].mxu0 %vm316_vm0, %v262_v8  ;;  %895 = vmatmul.mubr.msk.f32.gmra.mrb[4].mxu1 %vm316_vm0, %v266_v11 }
  0x68   : > { %888 = vmatprep.mubr.msk.f32.mxu0 %vm316_vm0, %v263_v1  ;;  %896 = vmatprep.mubr.msk.f32.mxu1 %vm316_vm0, %v267_v2 }
  0x6b   : > { %889 = vmatmul.mubr.msk.f32.gmra.mrb[6].mxu0 %vm316_vm0, %v263_v1  ;;  %897 = vmatmul.mubr.msk.f32.gmra.mrb[6].mxu1 %vm316_vm0, %v267_v2 }
  0x92   : > { %v279_v12 = vpop.permute.xlu0 %278  ;;  %v289_v14 = vpop.permute.xlu1 %288 }
  0x96   : > { %v284_v13 = vpop.permute.xlu0 %283  ;;  %v1357_v16 = vpop.permute.xlu1 %293 }
  0x9a   : > { %v609_v15 = vpop.permute.xlu0 %608  ;;  %v614_v18 = vpop.permute.xlu1 %613 }
  0xa1   : > { %v299_v17 = vpop.permute.xlu0 %298  ;;  %v1359_v26 = vpop.permute.xlu1 %618 }
  0xa5   : > { %v304_v25 = vpop.permute.xlu0 %303  ;;  %v1363_v43 = vpop.permute.xlu1 %623 }
  0xa9   : > { %v309_v42 = vpop.permute.xlu0 %308  ;;  %v629_v7 = vpop.permute.xlu1 %628 }
  0xad   : > { %v314_v11 = vpop.permute.xlu0 %313 }
 0x132   : > { %v503_v19 = vpop.f32.mrb[0].mxu0  ;;  %v527_v20 = vpop.f32.mrb[0].mxu1 }
 0x133   : > { %v504_v21 = vadd.f32 %v503_v19, %v279_v12  ;;  %v505_v22 = vpop.f32.mrb[1].mxu0  ;;  %v529_v23 = vpop.f32.mrb[1].mxu1  ;;  %v528_v31 = vadd.f32 %v527_v20, %v299_v17 }
 0x134   : > { %v506_v24 = vadd.f32 %v505_v22, %v279_v12  ;;  %v1361_v34 = vadd.f32 %v529_v23, %v299_v17 }
 0x135   : > { %v566_v27 = vmul.f32 0.01, %v504_v21  ;;  %vm550_vm2 = vcmp.gt.f32.partialorder %v504_v21, 0.0  ;;  %v574_v44 = vmul.f32 0.01, %v528_v31  ;;  %vm558_vm6 = vcmp.gt.f32.partialorder %v528_v31, 0.0 }
 0x136   : > { %v567_v28 = vmul.f32 0.01, %v506_v24  ;;  %v509_v29 = vpop.f32.mrb[2].mxu0  ;;  %v533_v30 = vpop.f32.mrb[2].mxu1  ;;  %vm551_vm3 = vcmp.gt.f32.partialorder %v506_v24, 0.0  ;;  %vm559_vm7 = vcmp.gt.f32.partialorder %v1361_v34, 0.0 }
 0x137   : > { %v511_v32 = vpop.f32.mrb[3].mxu0  ;;  %v535_v33 = vpop.f32.mrb[3].mxu1  ;;  %v510_v35 = vadd.f32 %v509_v29, %v284_v13  ;;  %v582_v39 = vsel %vm550_vm2, %v504_v21, %v566_v27  ;;  %v534_v56 = vadd.f32 %v533_v30, %v304_v25  ;;  %v590_v61 = vsel %vm558_vm6, %v528_v31, %v574_v44 }
 0x138   : > { %v512_v36 = vadd.f32 %v511_v32, %v284_v13  ;;  %v583_v40 = vsel %vm551_vm3, %v506_v24, %v567_v28  ;;  %v646_v50 = vmul.f32 %v609_v15, %v582_v39  ;;  %v575_v62 = vmul.f32 0.01, %v1361_v34  ;;  %v634_v28 = vpop.permute.xlu1 %633 }
 0x139   : > { %vm552_vm4 = vcmp.gt.f32.partialorder %v510_v35, 0.0  ;;  %v568_v41 = vmul.f32 0.01, %v510_v35  ;;  %v647_v51 = vmul.f32 %v609_v15, %v583_v40  ;;  %v536_v4 = vadd.f32 %v535_v33, %v304_v25  ;;  %v639_v40 = vpop.permute.xlu0 %638 }
 0x13a   : > { %v515_v37 = vpop.f32.mrb[4].mxu0  ;;  %v539_v38 = vpop.f32.mrb[4].mxu1  ;;  %vm553_vm5 = vcmp.gt.f32.partialorder %v512_v36, 0.0  ;;  %v569_v45 = vmul.f32 0.01, %v512_v36  ;;  %v654_v1 = vmul.f32 %v629_v7, %v590_v61  ;;  %vm560_vm10 = vcmp.gt.f32.partialorder %v534_v56, 0.0 }
 0x13b   : > { %v584_v46 = vsel %vm552_vm4, %v510_v35, %v568_v41  ;;  %v516_v47 = vadd.f32 %v515_v37, %v289_v14  ;;  %v517_v48 = vpop.f32.mrb[5].mxu0  ;;  %v541_v49 = vpop.f32.mrb[5].mxu1  ;;  %v540_v10 = vadd.f32 %v539_v38, %v309_v42  ;;  %v576_v2 = vmul.f32 0.01, %v534_v56 }
 0x13c   : > { %v648_v52 = vmul.f32 %v614_v18, %v584_v46  ;;  %v585_v53 = vsel %vm553_vm5, %v512_v36, %v569_v45  ;;  %v518_v0 = vadd.f32 %v517_v48, %v289_v14  ;;  %v577_v17 = vmul.f32 0.01, %v536_v4 }
 0x13d   : > { %v649_v57 = vmul.f32 %v614_v18, %v585_v53  ;;  %vm554_vm8 = vcmp.gt.f32.partialorder %v516_v47, 0.0  ;;  %v570_v58 = vmul.f32 0.01, %v516_v47  ;;  %v542_v19 = vadd.f32 %v541_v49, %v309_v42 }
 0x13e   : > { %v521_v54 = vpop.f32.mrb[6].mxu0  ;;  %v545_v55 = vpop.f32.mrb[6].mxu1  ;;  %v662_v63 = vadd.f32 %v648_v52, %v646_v50  ;;  %vm555_vm9 = vcmp.gt.f32.partialorder %v518_v0, 0.0  ;;  %v571_v8 = vmul.f32 0.01, %v518_v0  ;;  %vm562_vm12 = vcmp.gt.f32.partialorder %v540_v10, 0.0 }
 0x13f   : > { %v523_v59 = vpop.f32.mrb[7].mxu0  ;;  %v547_v60 = vpop.f32.mrb[7].mxu1  ;;  %v675_v3 = vadd.f32 %v649_v57, %v647_v51  ;;  %v586_v5 = vsel %vm554_vm8, %v516_v47, %v570_v58  ;;  %v522_v6 = vadd.f32 %v521_v54, %v1357_v16  ;;  %v546_v14 = vadd.f32 %v545_v55, %v314_v11 }
 0x140   : > { %v650_v9 = vmul.f32 %v1359_v26, %v586_v5  ;;  %v587_v13 = vsel %vm555_vm9, %v518_v0, %v571_v8  ;;  %v524_v20 = vadd.f32 %v523_v59, %v1357_v16  ;;  %v578_v21 = vmul.f32 0.01, %v540_v10  ;;  %v644_v47 = vpop.permute.xlu1 %643 }
 0x141   : > { %vm556_vm11 = vcmp.gt.f32.partialorder %v522_v6, 0.0  ;;  %v572_v15 = vmul.f32 0.01, %v522_v6  ;;  %v651_v18 = vmul.f32 %v1359_v26, %v587_v13  ;;  %v548_v23 = vadd.f32 %v547_v60, %v314_v11 }
 0x142   : > { %v663_v12 = vadd.f32 %v662_v63, %v650_v9  ;;  %vm557_vm13 = vcmp.gt.f32.partialorder %v524_v20, 0.0  ;;  %v573_v27 = vmul.f32 0.01, %v524_v20  ;;  %v591_v29 = vsel %vm559_vm7, %v1361_v34, %v575_v62  ;;  %v692_v9 = vpop.permute.xlu0 %691 }
 0x143   : > { %v588_v22 = vsel %vm556_vm11, %v522_v6, %v572_v15  ;;  %v676_v24 = vadd.f32 %v675_v3, %v651_v18  ;;  %v592_v30 = vsel %vm560_vm10, %v534_v56, %v576_v2  ;;  %vm561_vm14 = vcmp.gt.f32.partialorder %v536_v4, 0.0 }
 0x144   : > { %v652_v25 = vmul.f32 %v1363_v43, %v588_v22  ;;  %v580_v26 = vmul.f32 0.01, %v546_v14  ;;  %v579_v31 = vmul.f32 0.01, %v542_v19  ;;  %vm564_vm15 = vcmp.gt.f32.partialorder %v546_v14, 0.0 }
 0x145   : > { %v589_v32 = vsel %vm557_vm13, %v524_v20, %v573_v27  ;;  %v594_v33 = vsel %vm562_vm12, %v540_v10, %v578_v21  ;;  %vm563_vm0 = vcmp.gt.f32.partialorder %v542_v19, 0.0  ;;  %v656_v36 = vmul.f32 %v634_v28, %v592_v30 }
 0x146   : > { %v664_v16 = vadd.f32 %v663_v12, %v652_v25  ;;  %v653_v35 = vmul.f32 %v1363_v43, %v589_v32  ;;  %v593_v37 = vsel %vm561_vm14, %v536_v4, %v577_v17  ;;  %v581_v39 = vmul.f32 0.01, %v548_v23 }
 0x147   : > { %v655_v41 = vmul.f32 %v629_v7, %v591_v29  ;;  %v596_v34 = vsel %vm564_vm15, %v546_v14, %v580_v26  ;;  %vm565_vm1 = vcmp.gt.f32.partialorder %v548_v23, 0.0  ;;  %v658_v44 = vmul.f32 %v639_v40, %v594_v33 }
 0x148   : > { %v665_v38 = vadd.f32 %v664_v16, %v654_v1  ;;  %v677_v42 = vadd.f32 %v676_v24, %v653_v35  ;;  %v595_v45 = vsel %vm563_vm0, %v542_v19, %v579_v31  ;;  %v657_v48 = vmul.f32 %v634_v28, %v593_v37 }
 0x149   : > { %v660_v50 = vmul.f32 %v644_v47, %v596_v34  ;;  %v597_v52 = vsel %vm565_vm1, %v548_v23, %v581_v39  ;;  %v659_v53 = vmul.f32 %v639_v40, %v595_v45  ;;  %v694_v55 = vlaneseq }
 0x14a   : > { %v666_v46 = vadd.f32 %v665_v38, %v656_v36  ;;  %v678_v49 = vadd.f32 %v677_v42, %v655_v41  ;;  %v661_v56 = vmul.f32 %v644_v47, %v597_v52  ;;  %v1070_v5 = vmov 1966171168  }
 0x14b   : > { %v695_v61 = vshrl.u32 %v694_v55, 7  ;;  %v704_v6 = vunpack.c.l.s4 %v1070_v5  ;;  %vm720_vm2 = vcmp.lt.s32.totalorder %v694_v55, 256 }
 0x14c   : > { %v667_v51 = vadd.f32 %v666_v46, %v658_v44  ;;  %v679_v43 = vadd.f32 %v678_v49, %v657_v48 }
 0x14d   : > { %v696_v4 = vsub.s32 0, %v695_v61  ;;  %v705_v1 = vunpack.c.0.s8 %v704_v6 }
 0x14e   : > { %v668_v54 = vadd.f32 %v667_v51, %v660_v50  ;;  %v680_v57 = vadd.f32 %v679_v43, %v659_v53 }
 0x14f   : > { %v697_v2 = vrot.slane %v692_v9, %v696_v4  ;;  %v708_v14 = vsub.s32 %v705_v1, %v695_v61 }
 0x150   : > { %v669_v58 = vrot.slane %v668_v54, 4  ;;  %v681_v59 = vadd.f32 %v680_v57, %v661_v56 }
 0x152   : > { %v670_v60 = vadd.f32 %v669_v58, %v668_v54  ;;  %v682_v62 = vrot.slane %v681_v59, 4 }
 0x154   : > { %v671_v63 = vrot.slane %v670_v60, 2  ;;  %v683_v0 = vadd.f32 %v682_v62, %v681_v59 }
 0x156   : > { %v672_v3 = vadd.f32 %v671_v63, %v670_v60  ;;  %v684_v7 = vrot.slane %v683_v0, 2 }
 0x158   : > { %v673_v10 = vrot.slane %v672_v3, 1  ;;  %v685_v8 = vadd.f32 %v684_v7, %v683_v0 }
 0x15a   : > { %v674_v11 = vadd.f32 %v673_v10, %v672_v3  ;;  %v686_v12 = vrot.slane %v685_v8, 1 }
 0x15c   : > { %v687_v13 = vadd.f32 %v686_v12, %v685_v8  ;;  %v698_v15 = vadd.f32 %v697_v2, %v674_v11 }
 0x15e   : > { %v699_v17 = vadd.f32 %v697_v2, %v687_v13 }
 0x160   : > { %v702_v18 = vcombine.low %v698_v15, %v699_v17 }
 0x162   : > { %v709_v19 = vrot.slane %v702_v18, %v708_v14 }
 0x164   : > { %v716_v20 = vrot.slane %v709_v19, %v708_v14 }
 0x166   : > { %722 = vst.msk [vmem:[%s220_s12] sm:$0x3] %vm720_vm2, %v716_v20 }
 0x167   : > { %1018 = shalt.err (!%p1015_p3)
}
 0x168   : > { %s1019_s6 = scalar_lea.hbm %s1384_s16, 32  ;;  %s1023_s7 = scalar_lea.hbm %s1431_s5, 64 }
 0x169   : > { %p1020_p4 = scmp.ne.s32.totalorder %s1384_s16, %s1019_s6  ;;  %p1024_p9 = scmp.lt.u32.totalorder %s1384_s16, %s1431_s5 }
 0x16a   : > { %p1025_p10 = scmp.lt.u32.totalorder %s1023_s7, %s1019_s6  ;;  %p1027_p12 = scmp.lt.u32.totalorder %s1019_s6, %s1384_s16 }
 0x16b   : > { %p1021_p7 = pnand %p1020_p4, %p1140_p5 }
 0x16c   : > { %p1026_p11 = por %p1025_p10, %p1024_p9 }
 0x16d   : > { %p1022_p8 = pneg %p1021_p7 }
 0x16e   : > { %p1028_p13 = por %p1027_p12, %p1026_p11 }
 0x170   : > { %p1029_p0 = pnand %p1028_p13, %p1022_p8 }
 0x172   : > { %1032 = shalt.err (!%p1029_p0)
}
 0x173   : > { %962 = dma.vmem_to_hbm [thread:$0]  (%p1140_p5), %s1386_s13, 32, %s1384_s16, %s724_s17  }
 0x174 PF: > { %p968_p1 = scmp.ge.s32.totalorder %s1067_s23, 2  ;;  %s750_s10 = sand.u32 1, %s1055_s20  }
 0x175   : > { %s751_s11 = scalar_lea.sflag [#allocation4], %s750_s10 }
 0x176   : > { %p965_p2 = pnand %p968_p1, %p1144_p6 }
 0x178   : > { %1050 = dma.done.wait (!%p965_p2), %s751_s11, 32  }
 0x179   : > { %1052 = vsyncadd (!%p965_p2), %s751_s11, 4294967264  ;;  %p17_p3 = scmp.ge.s32.totalorder %s1128_s25, 4   ;;  %s1436_s20 = smov %s1059_s21 }
 0x17a   : > { %s1437_s21 = smov %s1063_s22  ;;  %s1438_s22 = smov %s1138_s28 }
 0x17b   : > { %s1439_s23 = smov %s1128_s25  ;;  %19 = sbr.rel (!%p17_p3) target bundleno = 6 (0x6), region = 75 }
 0x182   :  { %756 = vsyncpa [#allocation4], 1 }
 0x183   :  { %758 = vsyncpa [#allocation4 + $0x1], 1 }

</bundles_post_ra>
